<compile_context>
chip_gen: v6e
topology: v6e:2x2x1
jax: 0.10.0
libtpu: 0.0.40
codegen_flags: <defaults>
</compile_context>

<pallas_src>
import jax
import jax.numpy as jnp
from jax.experimental import pallas as pl
from jax.experimental.pallas import tpu as pltpu


def _round_up(x, m):
    return ((x + m - 1) // m) * m


# --------------------------------------------------------------------------- #
# Shared in-kernel math
# --------------------------------------------------------------------------- #
def _tag_projection(tag_ref, wle_ref, ble_ref):
    """tag @ W_le + b_le with f32 accumulation."""
    return (
        jnp.dot(tag_ref[...].astype(wle_ref.dtype), wle_ref[...],
                preferred_element_type=jnp.float32)
        + ble_ref[...].astype(jnp.float32)
    )


def _mlp_head(tag_proj, user_emb, book_emb,
              w1_ref, b1_ref, w2_ref, b2_ref, w3_ref, b3_ref):
    """book_integrate = book_emb + tag_proj; MLP(cat(user_emb, book_integrate))."""
    f32 = jnp.float32
    book_int = book_emb.astype(f32) + tag_proj
    # Single K=2E dot instead of two K=E dots (w1 is the stacked (2E, H) weight).
    cat = jnp.concatenate([user_emb.astype(f32), book_int], axis=1)
    h1 = jnp.maximum(
        jnp.dot(cat.astype(w1_ref.dtype), w1_ref[...], preferred_element_type=f32)
        + b1_ref[...].astype(f32),
        0.0,
    )
    h2 = jnp.maximum(
        jnp.dot(h1.astype(w2_ref.dtype), w2_ref[...], preferred_element_type=f32)
        + b2_ref[...].astype(f32),
        0.0,
    )
    return (
        jnp.dot(h2.astype(w3_ref.dtype), w3_ref[...], preferred_element_type=f32)
        + b3_ref[...].astype(f32)
    )


# --------------------------------------------------------------------------- #
# Primary kernel: VMEM-resident tables, one-hot MXU gather (no DMAs at all)
# --------------------------------------------------------------------------- #
def mf_kernel_vmem(
    uidx_ref, bidx_ref,      # (TB, 1) int32, batch-blocked
    tag_ref,                 # (TB, H)  batch-blocked
    ue_ref, be_ref,          # (U_pad, E), (Bk_pad, E)  VMEM-resident tables
    wle_ref, ble_ref,        # (H, E), (1, E)
    w1_ref, b1_ref,          # (2E, H), (1, H)
    w2_ref, b2_ref,          # (H, H), (1, H)
    w3_ref, b3_ref,          # (H, 1), (1, 1)
    out_ref,                 # (TB, 1)
):
    tb = tag_ref.shape[0]

    # One-hot gather on the MXU: (TB, U) @ (U, E).  Table rows are lane-padded
    # to a multiple of 128 in the wrapper so the one-hot is lane-dense; padded
    # rows are never selected (indices < original row count).
    u_oh = (
        uidx_ref[...]
        == jax.lax.broadcasted_iota(jnp.int32, (tb, ue_ref.shape[0]), 1)
    ).astype(ue_ref.dtype)
    b_oh = (
        bidx_ref[...]
        == jax.lax.broadcasted_iota(jnp.int32, (tb, be_ref.shape[0]), 1)
    ).astype(be_ref.dtype)
    user_emb = jnp.dot(u_oh, ue_ref[...], preferred_element_type=jnp.float32)
    book_emb = jnp.dot(b_oh, be_ref[...], preferred_element_type=jnp.float32)

    tag_proj = _tag_projection(tag_ref, wle_ref, ble_ref)
    out_ref[...] = _mlp_head(
        tag_proj, user_emb, book_emb,
        w1_ref, b1_ref, w2_ref, b2_ref, w3_ref, b3_ref,
    ).astype(out_ref.dtype)


# --------------------------------------------------------------------------- #
# Fallback kernel: tables stay in HBM, per-row async-copy gather
# --------------------------------------------------------------------------- #
def mf_kernel_hbm(
    uidx_ref, bidx_ref,      # SMEM scalar prefetch: (Bpad,) int32 each
    tag_ref,                 # (TB, H) VMEM, batch-blocked
    ue_hbm, be_hbm,          # (num_users, E), (num_books, E) in HBM (pl.ANY)
    wle_ref, ble_ref,
    w1_ref, b1_ref,
    w2_ref, b2_ref,
    w3_ref, b3_ref,
    out_ref,                 # (TB, 1)
    ue_buf, be_buf,          # (TB, E) VMEM gather destinations
    sem,                     # DMA semaphores, shape (2,)
):
    tb = tag_ref.shape[0]
    base = pl.program_id(0) * tb

    # TODO(synk): cross-step double-buffer the gather ((2,TB,E) scratch, issue
    # tile i+1's rows while computing tile i) and unroll the issue loop so SMEM
    # index loads interleave with the descriptor pushes.
    @pl.loop(0, tb)
    def _issue(r):
        u = uidx_ref[base + r]
        b = bidx_ref[base + r]
        pltpu.make_async_copy(
            ue_hbm.at[pl.ds(u, 1), :], ue_buf.at[pl.ds(r, 1), :], sem.at[0]
        ).start()
        pltpu.make_async_copy(
            be_hbm.at[pl.ds(b, 1), :], be_buf.at[pl.ds(r, 1), :], sem.at[1]
        ).start()

    # Tag projection is independent of the gathered rows -> overlaps the DMAs.
    tag_proj = _tag_projection(tag_ref, wle_ref, ble_ref)

    # Drain: waits only need the semaphore + transfer size, so rebuild the
    # descriptors with a fixed source row (no SMEM index re-reads after wait).
    @pl.loop(0, tb)
    def _drain(r):
        pltpu.make_async_copy(
            ue_hbm.at[pl.ds(0, 1), :], ue_buf.at[pl.ds(r, 1), :], sem.at[0]
        ).wait()
        pltpu.make_async_copy(
            be_hbm.at[pl.ds(0, 1), :], be_buf.at[pl.ds(r, 1), :], sem.at[1]
        ).wait()

    out_ref[...] = _mlp_head(
        tag_proj, ue_buf[...], be_buf[...],
        w1_ref, b1_ref, w2_ref, b2_ref, w3_ref, b3_ref,
    ).astype(out_ref.dtype)


# --------------------------------------------------------------------------- #
# Wrapper
# --------------------------------------------------------------------------- #
def matrix_factorization_forward(params, user, book, tag_embedding, *,
                                 block_b=512,
                                 param_dtype=None,
                                 vmem_table_budget=16 * 1024 * 1024):
    """Forward pass: fused embedding gather + tag projection + 3-layer MLP."""
    B = user.shape[0]
    num_users, E = params["user_embeddings"].shape
    num_books = params["book_embeddings"].shape[0]
    H = tag_embedding.shape[1]

    if param_dtype is not None:
        # bf16 tables/weights halve HBM/DMA bytes on v6e/v7x; dots still
        # accumulate in f32 (v5e gets the bandwidth win only, no VPU bf16).
        params = jax.tree_util.tree_map(lambda x: x.astype(param_dtype), params)

    # --- batch tiling --------------------------------------------------------
    b8 = _round_up(B, 8)
    tb = min(block_b, b8)
    if b8 // tb < 2 and b8 >= 16:
        tb = _round_up(b8 // 2, 8)      # >= 2 grid steps: both v7x TCs get work
    b_pad = _round_up(B, tb)
    pad = b_pad - B
    n_blocks = b_pad // tb

    tag_p = jnp.pad(tag_embedding, ((0, pad), (0, 0)))
    user_i = jnp.pad(user.astype(jnp.int32), (0, pad))   # pad index 0 = valid row
    book_i = jnp.pad(book.astype(jnp.int32), (0, pad))

    tdtype = params["user_embeddings"].dtype
    # Lane-pad table rows to 128 so the one-hot gather matmul is lane-dense.
    u_rows = _round_up(num_users, 128)
    b_rows = _round_up(num_books, 128)
    table_bytes = (u_rows + b_rows) * E * jnp.dtype(tdtype).itemsize
    use_vmem_tables = table_bytes <= vmem_table_budget

    # Weights/biases: constant index_maps -> resident in VMEM across grid steps.
    res = lambda i, *_: (0, 0)
    blk = lambda i, *_: (i, 0)
    weight_specs = [
        pl.BlockSpec((H, E), res),        # w_le
        pl.BlockSpec((1, E), res),        # b_le
        pl.BlockSpec((2 * E, H), res),    # w1 (stacked user/book halves)
        pl.BlockSpec((1, H), res),        # b1
        pl.BlockSpec((H, H), res),        # w2
        pl.BlockSpec((1, H), res),        # b2
        pl.BlockSpec((H, 1), res),        # w3
        pl.BlockSpec((1, 1), res),        # b3
    ]
    weights = (params["w_le"], params["b_le"], params["w1"], params["b1"],
               params["w2"], params["b2"], params["w3"], params["b3"])

    if use_vmem_tables:
        # --- primary path: tables resident in VMEM, one-hot MXU gather -------
        ue_p = jnp.pad(params["user_embeddings"], ((0, u_rows - num_users), (0, 0)))
        be_p = jnp.pad(params["book_embeddings"], ((0, b_rows - num_books), (0, 0)))
        # Explicit budget: tables + weights + double-buffered activations stay
        # well inside v7x's 64 MiB physical VMEM.
        vmem_limit = int(table_bytes + (16 << 20))

        out = pl.pallas_call(
            mf_kernel_vmem,
            out_shape=jax.ShapeDtypeStruct((b_pad, 1), jnp.float32),
            grid_spec=pltpu.PrefetchScalarGridSpec(
                num_scalar_prefetch=0,
                grid=(n_blocks,),
                in_specs=[
                    pl.BlockSpec((tb, 1), blk),          # user indices
                    pl.BlockSpec((tb, 1), blk),          # book indices
                    pl.BlockSpec((tb, H), blk),          # tag embedding
                    pl.BlockSpec((u_rows, E), res),      # user table (VMEM resident)
                    pl.BlockSpec((b_rows, E), res),      # book table (VMEM resident)
                ] + weight_specs,
                out_specs=pl.BlockSpec((tb, 1), blk),
            ),
            compiler_params=pltpu.CompilerParams(
                dimension_semantics=("parallel",),
                vmem_limit_bytes=vmem_limit,
            ),
        )(
            user_i.reshape(b_pad, 1), book_i.reshape(b_pad, 1), tag_p,
            ue_p, be_p, *weights,
        )
    else:
        # --- fallback path: tables in HBM, per-row async-copy gather ---------
        out = pl.pallas_call(
            mf_kernel_hbm,
            out_shape=jax.ShapeDtypeStruct((b_pad, 1), jnp.float32),
            grid_spec=pltpu.PrefetchScalarGridSpec(
                num_scalar_prefetch=2,
                grid=(n_blocks,),
                in_specs=[
                    pl.BlockSpec((tb, H), blk),          # tag embedding
                    pl.BlockSpec(memory_space=pl.ANY),   # user table (HBM)
                    pl.BlockSpec(memory_space=pl.ANY),   # book table (HBM)
                ] + weight_specs,
                out_specs=pl.BlockSpec((tb, 1), blk),
                scratch_shapes=[
                    pltpu.VMEM((tb, E), tdtype),
                    pltpu.VMEM((tb, E), tdtype),
                    pltpu.SemaphoreType.DMA((2,)),
                ],
            ),
            compiler_params=pltpu.CompilerParams(
                dimension_semantics=("parallel",),
            ),
        )(
            user_i, book_i,                              # scalar prefetch (SMEM)
            tag_p,
            params["user_embeddings"], params["book_embeddings"],
            *weights,
        )

    return out[:B]


# --------------------------------------------------------------------------- #
# Params / reference / demo
# --------------------------------------------------------------------------- #
def init_params(key, num_users, num_books, embedding_dim, hidden_dim):
    ks = jax.random.split(key, 9)
    E, H = embedding_dim, hidden_dim
    return {
        # nn.Embedding default init: N(0, 1)
        "user_embeddings": jax.random.normal(ks[0], (num_users, E), jnp.float32),
        "book_embeddings": jax.random.normal(ks[1], (num_books, E), jnp.float32),
        # linear_embedding: Linear(hidden_dim, embedding_dim) -> stored (H, E)
        "w_le": jax.random.normal(ks[2], (H, E), jnp.float32) * 0.1,
        "b_le": jax.random.normal(ks[3], (1, E), jnp.float32) * 0.1,
        # mlp[0]: Linear(2E, H) -> stored (2E, H), user rows first then book rows
        "w1": jax.random.normal(ks[4], (2 * E, H), jnp.float32) * 0.1,
        "b1": jax.random.normal(ks[5], (1, H), jnp.float32) * 0.1,
        # mlp[2]: Linear(H, H) -> stored (H, H)
        "w2": jax.random.normal(ks[6], (H, H), jnp.float32) * 0.1,
        "b2": jax.random.normal(ks[7], (1, H), jnp.float32) * 0.1,
        # mlp[4]: Linear(H, 1) -> stored (H, 1)
        "w3": jax.random.normal(ks[8], (H, 1), jnp.float32) * 0.1,
        "b3": jnp.zeros((1, 1), jnp.float32),
    }


def reference_forward(params, user, book, tag_embedding):
    """Pure-JAX reference matching the PyTorch forward semantics."""
    ue = jnp.take(params["user_embeddings"], user, axis=0)
    be = jnp.take(params["book_embeddings"], book, axis=0)
    tag_proj = tag_embedding @ params["w_le"] + params["b_le"]
    book_int = be + tag_proj
    cat = jnp.concatenate([ue, book_int], axis=1)
    h1 = jnp.maximum(cat @ params["w1"] + params["b1"], 0.0)
    h2 = jnp.maximum(h1 @ params["w2"] + params["b2"], 0.0)
    return h2 @ params["w3"] + params["b3"]


if __name__ == "__main__":
    num_users, num_books = 10, 12
    embedding_dim, hidden_dim = 32, 32
    batch = 10   # NOT a multiple of the tile -> exercises padding + 2-block grid

    key = jax.random.PRNGKey(0)
    kp, ku, kb, kt = jax.random.split(key, 4)

    params = init_params(kp, num_users, num_books, embedding_dim, hidden_dim)
    user = jax.random.randint(ku, (batch,), 0, num_users, jnp.int32)
    book = jax.random.randint(kb, (batch,), 0, num_books, jnp.int32)
    tag_embedding = jax.random.normal(kt, (batch, hidden_dim), jnp.float32)

    out = matrix_factorization_forward(params, user, book, tag_embedding)
    out = jax.block_until_ready(out)

    ref = reference_forward(params, user, book, tag_embedding)
    assert out.shape == (batch, 1), out.shape
    assert jnp.allclose(out, ref, atol=1e-4, rtol=1e-4), (out, ref)

    print("KERNEL_OK")
</pallas_src>

<mosaic_0001>
module attributes {stable_mosaic.version = 11 : i64} {
  func.func @mf_kernel_vmem(%arg0: i32, %arg1: memref<8x1xi32, #tpu.memory_space<vmem>>, %arg2: memref<8x1xi32, #tpu.memory_space<vmem>>, %arg3: memref<8x32xf32, #tpu.memory_space<vmem>>, %arg4: memref<128x32xf32, #tpu.memory_space<vmem>>, %arg5: memref<128x32xf32, #tpu.memory_space<vmem>>, %arg6: memref<32x32xf32, #tpu.memory_space<vmem>>, %arg7: memref<1x32xf32, #tpu.memory_space<vmem>>, %arg8: memref<64x32xf32, #tpu.memory_space<vmem>>, %arg9: memref<1x32xf32, #tpu.memory_space<vmem>>, %arg10: memref<32x32xf32, #tpu.memory_space<vmem>>, %arg11: memref<1x32xf32, #tpu.memory_space<vmem>>, %arg12: memref<32x1xf32, #tpu.memory_space<vmem>>, %arg13: memref<1x1xf32, #tpu.memory_space<vmem>>, %arg14: memref<8x1xf32, #tpu.memory_space<vmem>>) attributes {dimension_semantics = [#tpu.dimension_semantics<parallel>], iteration_bounds = array<i64: 2>, scalar_prefetch = 0 : i64, scratch_operands = 0 : i64, tpu.core_type = #tpu.core_type<tc>, window_params = [{transform_indices = @transform_0, window_bounds = array<i64: 8, 1>}, {transform_indices = @transform_1, window_bounds = array<i64: 8, 1>}, {transform_indices = @transform_2, window_bounds = array<i64: 8, 32>}, {pipeline_mode = #tpu.pipeline_mode<synchronous>, transform_indices = @transform_3, window_bounds = array<i64: 128, 32>}, {pipeline_mode = #tpu.pipeline_mode<synchronous>, transform_indices = @transform_4, window_bounds = array<i64: 128, 32>}, {pipeline_mode = #tpu.pipeline_mode<synchronous>, transform_indices = @transform_5, window_bounds = array<i64: 32, 32>}, {pipeline_mode = #tpu.pipeline_mode<synchronous>, transform_indices = @transform_6, window_bounds = array<i64: 1, 32>}, {pipeline_mode = #tpu.pipeline_mode<synchronous>, transform_indices = @transform_7, window_bounds = array<i64: 64, 32>}, {pipeline_mode = #tpu.pipeline_mode<synchronous>, transform_indices = @transform_8, window_bounds = array<i64: 1, 32>}, {pipeline_mode = #tpu.pipeline_mode<synchronous>, transform_indices = @transform_9, window_bounds = array<i64: 32, 32>}, {pipeline_mode = #tpu.pipeline_mode<synchronous>, transform_indices = @transform_10, window_bounds = array<i64: 1, 32>}, {pipeline_mode = #tpu.pipeline_mode<synchronous>, transform_indices = @transform_11, window_bounds = array<i64: 32, 1>}, {pipeline_mode = #tpu.pipeline_mode<synchronous>, transform_indices = @transform_12, window_bounds = array<i64: 1, 1>}, {transform_indices = @transform_13, window_bounds = array<i64: 8, 1>}]} {
    %c0 = arith.constant 0 : index
    %c0_0 = arith.constant 0 : index
    %0 = vector.load %arg1[%c0, %c0_0] : memref<8x1xi32, #tpu.memory_space<vmem>>, vector<8x1xi32>
    %1 = tpu.iota {dimensions = array<i32: 1>} : vector<8x128xi32>
    %2 = vector.broadcast %0 : vector<8x1xi32> to vector<8x128xi32>
    %3 = arith.cmpi eq, %2, %1 : vector<8x128xi32>
    %4 = arith.extui %3 : vector<8x128xi1> to vector<8x128xi32>
    %5 = arith.sitofp %4 : vector<8x128xi32> to vector<8x128xf32>
    %c0_1 = arith.constant 0 : index
    %c0_2 = arith.constant 0 : index
    %6 = vector.load %arg2[%c0_1, %c0_2] : memref<8x1xi32, #tpu.memory_space<vmem>>, vector<8x1xi32>
    %7 = tpu.iota {dimensions = array<i32: 1>} : vector<8x128xi32>
    %8 = vector.broadcast %6 : vector<8x1xi32> to vector<8x128xi32>
    %9 = arith.cmpi eq, %8, %7 : vector<8x128xi32>
    %10 = arith.extui %9 : vector<8x128xi1> to vector<8x128xi32>
    %11 = arith.sitofp %10 : vector<8x128xi32> to vector<8x128xf32>
    %c0_3 = arith.constant 0 : index
    %c0_4 = arith.constant 0 : index
    %12 = vector.load %arg4[%c0_3, %c0_4] : memref<128x32xf32, #tpu.memory_space<vmem>>, vector<128x32xf32>
    %cst = arith.constant dense<0.000000e+00> : vector<8x32xf32>
    %13 = tpu.matmul %5, %12, %cst {dimension_numbers = #tpu.dot_dimension_numbers<[1], [0], [0], [1], [0, 0, 1, 1], [], []>} : vector<8x128xf32>, vector<128x32xf32>, vector<8x32xf32> -> vector<8x32xf32>
    %c0_5 = arith.constant 0 : index
    %c0_6 = arith.constant 0 : index
    %14 = vector.load %arg5[%c0_5, %c0_6] : memref<128x32xf32, #tpu.memory_space<vmem>>, vector<128x32xf32>
    %cst_7 = arith.constant dense<0.000000e+00> : vector<8x32xf32>
    %15 = tpu.matmul %11, %14, %cst_7 {dimension_numbers = #tpu.dot_dimension_numbers<[1], [0], [0], [1], [0, 0, 1, 1], [], []>} : vector<8x128xf32>, vector<128x32xf32>, vector<8x32xf32> -> vector<8x32xf32>
    %c0_8 = arith.constant 0 : index
    %c0_9 = arith.constant 0 : index
    %16 = vector.load %arg3[%c0_8, %c0_9] : memref<8x32xf32, #tpu.memory_space<vmem>>, vector<8x32xf32>
    %c0_10 = arith.constant 0 : index
    %c0_11 = arith.constant 0 : index
    %17 = vector.load %arg6[%c0_10, %c0_11] : memref<32x32xf32, #tpu.memory_space<vmem>>, vector<32x32xf32>
    %cst_12 = arith.constant dense<0.000000e+00> : vector<8x32xf32>
    %18 = tpu.matmul %16, %17, %cst_12 {dimension_numbers = #tpu.dot_dimension_numbers<[1], [0], [0], [1], [0, 0, 1, 1], [], []>} : vector<8x32xf32>, vector<32x32xf32>, vector<8x32xf32> -> vector<8x32xf32>
    %c0_13 = arith.constant 0 : index
    %c0_14 = arith.constant 0 : index
    %19 = vector.load %arg7[%c0_13, %c0_14] : memref<1x32xf32, #tpu.memory_space<vmem>>, vector<1x32xf32>
    %20 = vector.broadcast %19 : vector<1x32xf32> to vector<8x32xf32>
    %21 = arith.addf %18, %20 : vector<8x32xf32>
    %22 = arith.addf %15, %21 : vector<8x32xf32>
    %23 = tpu.concatenate %13, %22 in 1 : vector<8x32xf32>, vector<8x32xf32> -> vector<8x64xf32>
    %c0_15 = arith.constant 0 : index
    %c0_16 = arith.constant 0 : index
    %24 = vector.load %arg8[%c0_15, %c0_16] : memref<64x32xf32, #tpu.memory_space<vmem>>, vector<64x32xf32>
    %cst_17 = arith.constant dense<0.000000e+00> : vector<8x32xf32>
    %25 = tpu.matmul %23, %24, %cst_17 {dimension_numbers = #tpu.dot_dimension_numbers<[1], [0], [0], [1], [0, 0, 1, 1], [], []>} : vector<8x64xf32>, vector<64x32xf32>, vector<8x32xf32> -> vector<8x32xf32>
    %c0_18 = arith.constant 0 : index
    %c0_19 = arith.constant 0 : index
    %26 = vector.load %arg9[%c0_18, %c0_19] : memref<1x32xf32, #tpu.memory_space<vmem>>, vector<1x32xf32>
    %27 = vector.broadcast %26 : vector<1x32xf32> to vector<8x32xf32>
    %28 = arith.addf %25, %27 : vector<8x32xf32>
    %cst_20 = arith.constant 0.000000e+00 : f32
    %29 = vector.broadcast %cst_20 : f32 to vector<8x32xf32>
    %30 = arith.maximumf %28, %29 : vector<8x32xf32>
    %c0_21 = arith.constant 0 : index
    %c0_22 = arith.constant 0 : index
    %31 = vector.load %arg10[%c0_21, %c0_22] : memref<32x32xf32, #tpu.memory_space<vmem>>, vector<32x32xf32>
    %cst_23 = arith.constant dense<0.000000e+00> : vector<8x32xf32>
    %32 = tpu.matmul %30, %31, %cst_23 {dimension_numbers = #tpu.dot_dimension_numbers<[1], [0], [0], [1], [0, 0, 1, 1], [], []>} : vector<8x32xf32>, vector<32x32xf32>, vector<8x32xf32> -> vector<8x32xf32>
    %c0_24 = arith.constant 0 : index
    %c0_25 = arith.constant 0 : index
    %33 = vector.load %arg11[%c0_24, %c0_25] : memref<1x32xf32, #tpu.memory_space<vmem>>, vector<1x32xf32>
    %34 = vector.broadcast %33 : vector<1x32xf32> to vector<8x32xf32>
    %35 = arith.addf %32, %34 : vector<8x32xf32>
    %cst_26 = arith.constant 0.000000e+00 : f32
    %36 = vector.broadcast %cst_26 : f32 to vector<8x32xf32>
    %37 = arith.maximumf %35, %36 : vector<8x32xf32>
    %c0_27 = arith.constant 0 : index
    %c0_28 = arith.constant 0 : index
    %38 = vector.load %arg12[%c0_27, %c0_28] : memref<32x1xf32, #tpu.memory_space<vmem>>, vector<32x1xf32>
    %cst_29 = arith.constant dense<0.000000e+00> : vector<8x1xf32>
    %39 = tpu.matmul %37, %38, %cst_29 {dimension_numbers = #tpu.dot_dimension_numbers<[1], [0], [0], [1], [0, 0, 1, 1], [], []>} : vector<8x32xf32>, vector<32x1xf32>, vector<8x1xf32> -> vector<8x1xf32>
    %c0_30 = arith.constant 0 : index
    %c0_31 = arith.constant 0 : index
    %40 = vector.load %arg13[%c0_30, %c0_31] : memref<1x1xf32, #tpu.memory_space<vmem>>, vector<1x1xf32>
    %41 = vector.broadcast %40 : vector<1x1xf32> to vector<8x1xf32>
    %42 = arith.addf %39, %41 : vector<8x1xf32>
    %c0_32 = arith.constant 0 : index
    %c0_33 = arith.constant 0 : index
    %43 = vector.load %arg14[%c0_32, %c0_33] : memref<8x1xf32, #tpu.memory_space<vmem>>, vector<8x1xf32>
    tpu.vector_store %arg14[%c0_32, %c0_33], %42 {strides = array<i32>} : memref<8x1xf32, #tpu.memory_space<vmem>>, vector<8x1xf32>,
    return
  }
  func.func @transform_0(%arg0: i32) -> (i32, i32) {
    %c0_i32 = arith.constant 0 : i32
    %c0_i32_0 = arith.constant 0 : i32
    return %arg0, %c0_i32 : i32, i32
  }
  func.func @transform_1(%arg0: i32) -> (i32, i32) {
    %c0_i32 = arith.constant 0 : i32
    %c0_i32_0 = arith.constant 0 : i32
    return %arg0, %c0_i32 : i32, i32
  }
  func.func @transform_2(%arg0: i32) -> (i32, i32) {
    %c0_i32 = arith.constant 0 : i32
    %c0_i32_0 = arith.constant 0 : i32
    return %arg0, %c0_i32 : i32, i32
  }
  func.func @transform_3(%arg0: i32) -> (i32, i32) {
    %c0_i32 = arith.constant 0 : i32
    %c0_i32_0 = arith.constant 0 : i32
    %c0_i32_1 = arith.constant 0 : i32
    return %c0_i32, %c0_i32_0 : i32, i32
  }
  func.func @transform_4(%arg0: i32) -> (i32, i32) {
    %c0_i32 = arith.constant 0 : i32
    %c0_i32_0 = arith.constant 0 : i32
    %c0_i32_1 = arith.constant 0 : i32
    return %c0_i32, %c0_i32_0 : i32, i32
  }
  func.func @transform_5(%arg0: i32) -> (i32, i32) {
    %c0_i32 = arith.constant 0 : i32
    %c0_i32_0 = arith.constant 0 : i32
    %c0_i32_1 = arith.constant 0 : i32
    return %c0_i32, %c0_i32_0 : i32, i32
  }
  func.func @transform_6(%arg0: i32) -> (i32, i32) {
    %c0_i32 = arith.constant 0 : i32
    %c0_i32_0 = arith.constant 0 : i32
    %c0_i32_1 = arith.constant 0 : i32
    return %c0_i32, %c0_i32_0 : i32, i32
  }
  func.func @transform_7(%arg0: i32) -> (i32, i32) {
    %c0_i32 = arith.constant 0 : i32
    %c0_i32_0 = arith.constant 0 : i32
    %c0_i32_1 = arith.constant 0 : i32
    return %c0_i32, %c0_i32_0 : i32, i32
  }
  func.func @transform_8(%arg0: i32) -> (i32, i32) {
    %c0_i32 = arith.constant 0 : i32
    %c0_i32_0 = arith.constant 0 : i32
    %c0_i32_1 = arith.constant 0 : i32
    return %c0_i32, %c0_i32_0 : i32, i32
  }
  func.func @transform_9(%arg0: i32) -> (i32, i32) {
    %c0_i32 = arith.constant 0 : i32
    %c0_i32_0 = arith.constant 0 : i32
    %c0_i32_1 = arith.constant 0 : i32
    return %c0_i32, %c0_i32_0 : i32, i32
  }
  func.func @transform_10(%arg0: i32) -> (i32, i32) {
    %c0_i32 = arith.constant 0 : i32
    %c0_i32_0 = arith.constant 0 : i32
    %c0_i32_1 = arith.constant 0 : i32
    return %c0_i32, %c0_i32_0 : i32, i32
  }
  func.func @transform_11(%arg0: i32) -> (i32, i32) {
    %c0_i32 = arith.constant 0 : i32
    %c0_i32_0 = arith.constant 0 : i32
    %c0_i32_1 = arith.constant 0 : i32
    return %c0_i32, %c0_i32_0 : i32, i32
  }
  func.func @transform_12(%arg0: i32) -> (i32, i32) {
    %c0_i32 = arith.constant 0 : i32
    %c0_i32_0 = arith.constant 0 : i32
    %c0_i32_1 = arith.constant 0 : i32
    return %c0_i32, %c0_i32_0 : i32, i32
  }
  func.func @transform_13(%arg0: i32) -> (i32, i32) {
    %c0_i32 = arith.constant 0 : i32
    %c0_i32_0 = arith.constant 0 : i32
    return %arg0, %c0_i32 : i32, i32
  }
}

</mosaic_0001>

<bundles_post_ra>
// kernel: tpu_custom_call.1
= control target key start
LH: loop header
LB: loop body
LE: loop exit
PB: predicated region body
PF: predicated region fallthrough
CT: control target
= control target key end

     0   :  { %s1392_s27 = smov 0   ;;  %s1654_s0 = inlined_call_operand.vmem [shape: s32[16,1], index: 0, kind: input, shape index: {}]   ;;  %s1655_s1 = inlined_call_operand.vmem [shape: s32[16,1], index: 1, kind: input, shape index: {}]   ;;  %s1656_s2 = inlined_call_operand.vmem [shape: f32[16,32], index: 2, kind: input, shape index: {}]   ;;  %s1657_s3 = inlined_call_operand.vmem [shape: f32[128,32], index: 3, kind: input, shape index: {}]   ;;  %s1658_s4 = inlined_call_operand.vmem [shape: f32[128,32], index: 4, kind: input, shape index: {}]   ;;  %s1659_s5 = inlined_call_operand.vmem [shape: f32[32,32], index: 5, kind: input, shape index: {}]   ;;  %s1660_s6 = inlined_call_operand.vmem [shape: f32[1,32], index: 6, kind: input, shape index: {}]   ;;  %s1661_s7 = inlined_call_operand.vmem [shape: f32[64,32], index: 7, kind: input, shape index: {}]   ;;  %s1662_s8 = inlined_call_operand.vmem [shape: f32[1,32], index: 8, kind: input, shape index: {}]   ;;  %s1663_s9 = inlined_call_operand.vmem [shape: f32[32,32], index: 9, kind: input, shape index: {}]   ;;  %s1664_s10 = inlined_call_operand.vmem [shape: f32[1,32], index: 10, kind: input, shape index: {}]   ;;  %s1665_s11 = inlined_call_operand.vmem [shape: f32[32,1], index: 11, kind: input, shape index: {}]   ;;  %s1666_s12 = inlined_call_operand.<no memory space> [shape: f32[1,1], index: 12, kind: input, shape index: {}]   ;;  %s1667_s13 = inlined_call_operand.vmem [shape: f32[16,1], index: 13, kind: output, shape index: {}]  }
   0x1   :  { %v18_v0 = vstv %s1666_s12 }
   0x2   :  { %19 = vst [vmem:[#allocation2] sm:$0x1] %v18_v0 }
   0x3 LB: > { %s1089_s28 = sadd.s32 4294967295, %s1312_s27   ;;  %p1093_p0 = scmp.ge.s32.totalorder %s1312_s27, 1  ;;  %s1312_s27 = sphi %s1392_s27, %s25_s27  }
   0x4   : > { %p406_p1 = scmp.lt.s32.totalorder %s1312_s27, 3 }
   0x6   : > { %p407_p2 = pnand %p1093_p0, %p406_p1 }
   0x7   : > { %p456_p3 = scmp.lt.s32.totalorder (!%p407_p2), %s1089_s28, 1  ;;  %s1318_s16 = smov (!%p407_p2), 32  }
   0x8   : > { %410 = sbr.rel (%p407_p2) target bundleno = 1046 (0x416), region = 72 }
   0xd   : > { %v594_v1 = vld [vmem:[%s1659_s5 + $0x18] sm:$0xff]  ;;  %v1314_v2 = vmov 0   ;;  %v1315_v3 = vmov 0.0   ;;  %v593_v4 = vld [vmem:[%s1659_s5 + $0x10] sm:$0xff]  ;;  %s1669_s28 = smov (!%p456_p3, %s1089_s28), 1  ;;  %vm1316_vm0 = vmmov 0   ;;  %v473_v42 = vlaneseq }
   0xe   : > { %1305 = vset.pattern.permute.xlu0 %v1314_v2  ;;  %1205 = vmatprep.subr.mxu1 %v1315_v3  ;;  %v503_v5 = vld [vmem:[%s1657_s3 + $0x78] sm:$0xff]  ;;  %v592_v6 = vld [vmem:[%s1659_s5 + $0x8] sm:$0xff]  ;;  %v502_v7 = vld [vmem:[%s1657_s3 + $0x70] sm:$0xff]  ;;  %s1420_s21 = sshll.u32 %s1669_s28, 3  ;;  %vm602_vm1 = vcmask 261120   ;;  %v1317_v45 = vmov 1.0  }
   0xf   : > { %1206 = vmatpush3.msra.mxu1 %v594_v1  ;;  %1213 = vmatprep.mubr.msk.f32.mxu1 %vm1316_vm0, %v1315_v3  ;;  %s463_s24 = scalar_lea.vmem %s1655_s1, %s1420_s21  ;;  %s459_s29 = scalar_lea.vmem %s1654_s0, %s1420_s21  ;;  %v591_v8 = vld [vmem:[%s1659_s5] sm:$0xff]  ;;  %v589_v11 = vld [vmem:[%s1658_s4 + $0x78] sm:$0xff]  ;;  %v501_v12 = vld [vmem:[%s1657_s3 + $0x68] sm:$0xff]  ;;  %v474_v43 = vand.u32 127, %v473_v42  ;;  %vm766_vm4 = vcmask 523264   ;;  %vm1010_vm5 = vcmask 7168  }
  0x10   : > { %1207 = vmatprep.subr.mxu1 %v1315_v3  ;;  %1170 = vmatprep.subr.mxu0 %v1315_v3  ;;  %v481_v9 = vld [vmem:[%s463_s24] sm:$0xff]  ;;  %s467_s15 = scalar_lea.vmem %s1656_s2, %s1420_s21  ;;  %v588_v14 = vld [vmem:[%s1658_s4 + $0x70] sm:$0xff]  ;;  %v587_v16 = vld [vmem:[%s1658_s4 + $0x68] sm:$0xff]  ;;  %s471_s22 = scalar_lea.vmem %s1667_s13, %s1420_s21 }
  0x11   : > { %1208 = vmatpush3.msra.mxu1 %v593_v4  ;;  %1171 = vmatpush3.msra.mxu0 %v503_v5  ;;  %v590_v10 = vld [vmem:[%s467_s15] sm:$0xff]  ;;  %v499_v17 = vld [vmem:[%s1657_s3 + $0x58] sm:$0xff]  ;;  %v498_v19 = vld [vmem:[%s1657_s3 + $0x50] sm:$0xff] }
  0x12   : > { %1209 = vmatprep.subr.mxu1 %v1315_v3  ;;  %1172 = vmatprep.subr.mxu0 %v1315_v3  ;;  %v472_v13 = vld [vmem:[%s459_s29] sm:$0xff]  ;;  %v585_v20 = vld [vmem:[%s1658_s4 + $0x58] sm:$0xff]  ;;  %v497_v21 = vld [vmem:[%s1657_s3 + $0x48] sm:$0xff] }
  0x13   : > { %1210 = vmatpush3.msra.mxu1 %v592_v6  ;;  %1173 = vmatpush3.msra.mxu0 %v502_v7  ;;  %v500_v15 = vld [vmem:[%s1657_s3 + $0x60] sm:$0xff]  ;;  %v584_v22 = vld [vmem:[%s1658_s4 + $0x50] sm:$0xff]  ;;  %v583_v24 = vld [vmem:[%s1658_s4 + $0x48] sm:$0xff] }
  0x14   : > { %483 = vperm.xlu0 %1305, %v481_v9   ;;  %1211 = vmatprep.subr.mxu1 %v1315_v3  ;;  %v586_v18 = vld [vmem:[%s1658_s4 + $0x60] sm:$0xff]  ;;  %v495_v25 = vld [vmem:[%s1657_s3 + $0x38] sm:$0xff]  ;;  %v494_v27 = vld [vmem:[%s1657_s3 + $0x30] sm:$0xff] }
  0x15   : > { %1212 = vmatpush3.msra.mxu1 %v591_v8  ;;  %1174 = vmatprep.subr.mxu0 %v1315_v3  ;;  %v496_v23 = vld [vmem:[%s1657_s3 + $0x40] sm:$0xff]  ;;  %v581_v28 = vld [vmem:[%s1658_s4 + $0x38] sm:$0xff]  ;;  %v493_v29 = vld [vmem:[%s1657_s3 + $0x28] sm:$0xff] }
  0x16   : > { %1214 = vmatmul.mubr.msk.f32.vlgmr.msra.gmra.mxu1 %vm602_vm1, %v590_v10  ;;  %1216 = vmatprep.subr.mxu1 %v1315_v3  ;;  %v582_v26 = vld [vmem:[%s1658_s4 + $0x40] sm:$0xff]  ;;  %v580_v30 = vld [vmem:[%s1658_s4 + $0x30] sm:$0xff]  ;;  %v579_v32 = vld [vmem:[%s1658_s4 + $0x28] sm:$0xff] }
  0x17   : > { %1217 = vmatpush3.msra.mxu1 %v589_v11  ;;  %1175 = vmatpush3.msra.mxu0 %v501_v12  ;;  %v492_v31 = vld [vmem:[%s1657_s3 + $0x20] sm:$0xff]  ;;  %v491_v33 = vld [vmem:[%s1657_s3 + $0x18] sm:$0xff]  ;;  %v490_v35 = vld [vmem:[%s1657_s3 + $0x10] sm:$0xff] }
  0x18   : > { %476 = vperm.xlu0 %1305, %v472_v13   ;;  %1218 = vmatprep.subr.mxu1 %v1315_v3  ;;  %v578_v34 = vld [vmem:[%s1658_s4 + $0x20] sm:$0xff]  ;;  %v577_v36 = vld [vmem:[%s1658_s4 + $0x18] sm:$0xff]  ;;  %v576_v37 = vld [vmem:[%s1658_s4 + $0x10] sm:$0xff] }
  0x19   : > { %1219 = vmatpush3.msra.mxu1 %v588_v14  ;;  %1176 = vmatprep.subr.mxu0 %v1315_v3  ;;  %v489_v38 = vld [vmem:[%s1657_s3 + $0x8] sm:$0xff]  ;;  %v488_v40 = vld [vmem:[%s1657_s3] sm:$0xff]  ;;  %v758_v48 = vld [vmem:[%s1661_s7 + $0x38] sm:$0xff] }
  0x1a   : > { %1220 = vmatprep.subr.mxu1 %v1315_v3  ;;  %1177 = vmatpush3.msra.mxu0 %v500_v15  ;;  %v575_v39 = vld [vmem:[%s1658_s4 + $0x8] sm:$0xff]  ;;  %v574_v41 = vld [vmem:[%s1658_s4] sm:$0xff]  ;;  %v757_v49 = vld [vmem:[%s1661_s7 + $0x30] sm:$0xff] }
  0x1b   : > { %1221 = vmatpush3.msra.mxu1 %v587_v16  ;;  %1178 = vmatprep.subr.mxu0 %v1315_v3  ;;  %v756_v51 = vld [vmem:[%s1661_s7 + $0x28] sm:$0xff]  ;;  %v755_v52 = vld [vmem:[%s1661_s7 + $0x20] sm:$0xff]  ;;  %v754_v53 = vld [vmem:[%s1661_s7 + $0x18] sm:$0xff] }
  0x1c   : > { %1222 = vmatprep.subr.mxu1 %v1315_v3  ;;  %1179 = vmatpush3.msra.mxu0 %v499_v17  ;;  %v753_v54 = vld [vmem:[%s1661_s7 + $0x10] sm:$0xff]  ;;  %v752_v55 = vld [vmem:[%s1661_s7 + $0x8] sm:$0xff]  ;;  %v751_v56 = vld [vmem:[%s1661_s7] sm:$0xff] }
  0x1d   : > { %1223 = vmatpush3.msra.mxu1 %v586_v18  ;;  %1180 = vmatprep.subr.mxu0 %v1315_v3  ;;  %v844_v57 = vld [vmem:[%s1663_s9 + $0x18] sm:$0xff]  ;;  %v1101_v58 = vld [vmem:[%s1660_s6] ss:$0 sm:$0xff]  ;;  %v843_v4 = vld [vmem:[%s1663_s9 + $0x10] sm:$0xff] }
  0x1e   : > { %1224 = vmatprep.subr.mxu1 %v1315_v3  ;;  %1181 = vmatpush3.msra.mxu0 %v498_v19  ;;  %v842_v5 = vld [vmem:[%s1663_s9 + $0x8] sm:$0xff]  ;;  %v841_v6 = vld [vmem:[%s1663_s9] sm:$0xff]  ;;  %v929_v7 = vld [vmem:[%s1665_s11 + $0x18] sm:$0xff] }
  0x1f   : > { %1225 = vmatpush3.msra.mxu1 %v585_v20  ;;  %1182 = vmatprep.subr.mxu0 %v1315_v3  ;;  %v1104_v8 = vld [vmem:[%s1662_s8] ss:$0 sm:$0xff]  ;;  %v928_v13 = vld [vmem:[%s1665_s11 + $0x10] sm:$0xff]  ;;  %v927_v14 = vld [vmem:[%s1665_s11 + $0x8] sm:$0xff] }
  0x20   : > { %1226 = vmatprep.subr.mxu1 %v1315_v3  ;;  %1183 = vmatpush3.msra.mxu0 %v497_v21  ;;  %v926_v15 = vld [vmem:[%s1665_s11] sm:$0xff] }
  0x21   : > { %1227 = vmatpush3.msra.mxu1 %v584_v22  ;;  %1184 = vmatprep.subr.mxu0 %v1315_v3  ;;  %v1106_v16 = vld [vmem:[%s1664_s10] ss:$0 sm:$0xff] }
  0x22   : > { %1228 = vmatprep.subr.mxu1 %v1315_v3  ;;  %1185 = vmatpush3.msra.mxu0 %v496_v23  ;;  %v1108_v21 = vld [vmem:[#allocation2] ss:$0 sm:$0xff] }
  0x23   : > { %1229 = vmatpush3.msra.mxu1 %v583_v24  ;;  %1186 = vmatprep.subr.mxu0 %v1315_v3 }
  0x24   : > { %1230 = vmatprep.subr.mxu1 %v1315_v3  ;;  %1187 = vmatpush3.msra.mxu0 %v495_v25 }
  0x25   : > { %1231 = vmatpush3.msra.mxu1 %v582_v26  ;;  %1188 = vmatprep.subr.mxu0 %v1315_v3 }
  0x26   : > { %1232 = vmatprep.subr.mxu1 %v1315_v3  ;;  %1189 = vmatpush3.msra.mxu0 %v494_v27 }
  0x27   : > { %1233 = vmatpush3.msra.mxu1 %v581_v28  ;;  %1190 = vmatprep.subr.mxu0 %v1315_v3 }
  0x28   : > { %1234 = vmatprep.subr.mxu1 %v1315_v3  ;;  %1191 = vmatpush3.msra.mxu0 %v493_v29 }
  0x29   : > { %1235 = vmatpush3.msra.mxu1 %v580_v30  ;;  %1192 = vmatprep.subr.mxu0 %v1315_v3 }
  0x2a   : > { %1236 = vmatprep.subr.mxu1 %v1315_v3  ;;  %1193 = vmatpush3.msra.mxu0 %v492_v31 }
  0x2b   : > { %1237 = vmatpush3.msra.mxu1 %v579_v32  ;;  %1194 = vmatprep.subr.mxu0 %v1315_v3 }
  0x2c   : > { %1238 = vmatprep.subr.mxu1 %v1315_v3  ;;  %1195 = vmatpush3.msra.mxu0 %v491_v33 }
  0x2d   : > { %1239 = vmatpush3.msra.mxu1 %v578_v34  ;;  %1196 = vmatprep.subr.mxu0 %v1315_v3 }
  0x2e   : > { %1240 = vmatprep.subr.mxu1 %v1315_v3  ;;  %1197 = vmatpush3.msra.mxu0 %v490_v35 }
  0x2f   : > { %1241 = vmatpush3.msra.mxu1 %v577_v36  ;;  %1248 = vmatprep.mubr.msk.f32.mxu1 %vm1316_vm0, %v1315_v3 }
  0x30   : > { %1242 = vmatprep.subr.mxu1 %v1315_v3  ;;  %1198 = vmatprep.subr.mxu0 %v1315_v3 }
  0x31   : > { %1243 = vmatpush3.msra.mxu1 %v576_v37  ;;  %1199 = vmatpush3.msra.mxu0 %v489_v38 }
  0x32   : > { %1244 = vmatprep.subr.mxu1 %v1315_v3  ;;  %1200 = vmatprep.subr.mxu0 %v1315_v3 }
  0x33   : > { %1245 = vmatpush3.msra.mxu1 %v575_v39  ;;  %1201 = vmatpush3.msra.mxu0 %v488_v40 }
  0x34   : > { %1246 = vmatprep.subr.mxu1 %v1315_v3  ;;  %1202 = vmatprep.mubr.msk.f32.mxu0 %vm1316_vm0, %v1315_v3 }
  0x35   : > { %1247 = vmatpush3.msra.mxu1 %v574_v41  ;;  %1251 = vmatprep.subr.mxu0 %v1315_v3 }
  0x36   : > { %1270 = vmatprep.subr.mxu1 %v1315_v3 }
  0x8f   : > { %v484_v44 = vpop.permute.xlu0 %483 }
  0x90   : > { %vm485_vm2 = vcmp.eq.s32.totalorder %v484_v44, %v474_v43 }
  0x91   : > { %1249 = vmatmul.mubr.msk.f32.vlgmr.msra.gmra.mxu1 %vm485_vm2, %v1317_v45 }
  0x92   : > { %1278 = vmatprep.mubr.msk.f32.mxu1 %vm1316_vm0, %v1315_v3  ;;  %1271 = vmatpush3.msra.mxu1 %v844_v57 }
  0x93   : > { %v477_v46 = vpop.permute.xlu0 %476  ;;  %1272 = vmatprep.subr.mxu1 %v1315_v3 }
  0x94   : > { %vm478_vm3 = vcmp.eq.s32.totalorder %v477_v46, %v474_v43  ;;  %1273 = vmatpush3.msra.mxu1 %v843_v4 }
  0x95   : > { %1203 = vmatmul.mubr.msk.f32.vlgmr.msra.gmra.mxu0 %vm478_vm3, %v1317_v45  ;;  %1274 = vmatprep.subr.mxu1 %v1315_v3 }
  0x96   : > { %1267 = vmatprep.mubr.msk.f32.mxu0 %vm1316_vm0, %v1315_v3  ;;  %1252 = vmatpush3.msra.mxu0 %v758_v48 }
  0x97   : > { %1253 = vmatprep.subr.mxu0 %v1315_v3  ;;  %1275 = vmatpush3.msra.mxu1 %v842_v5 }
  0x98   : > { %1254 = vmatpush3.msra.mxu0 %v757_v49  ;;  %1276 = vmatprep.subr.mxu1 %v1315_v3 }
  0x99   : > { %1255 = vmatprep.subr.mxu0 %v1315_v3  ;;  %1277 = vmatpush3.msra.mxu1 %v841_v6 }
  0x9a   : > { %1256 = vmatpush3.msra.mxu0 %v756_v51 }
  0x9b   : > { %1257 = vmatprep.subr.mxu0 %v1315_v3 }
  0x9c   : > { %1258 = vmatpush3.msra.mxu0 %v755_v52 }
  0x9d   : > { %1259 = vmatprep.subr.mxu0 %v1315_v3 }
  0x9e   : > { %1260 = vmatpush3.msra.mxu0 %v754_v53 }
  0x9f   : > { %1261 = vmatprep.subr.mxu0 %v1315_v3 }
  0xa0   : > { %1262 = vmatpush3.msra.mxu0 %v753_v54 }
  0xa1   : > { %1263 = vmatprep.subr.mxu0 %v1315_v3 }
  0xa2   : > { %1264 = vmatpush3.msra.mxu0 %v752_v55 }
  0xa3   : > { %1265 = vmatprep.subr.mxu0 %v1315_v3 }
  0xa4   : > { %1266 = vmatpush3.msra.mxu0 %v751_v56 }
  0xa5   : > { %1281 = vmatprep.subr.mxu0 %v1315_v3 }
  0xd6   : > { %v672_v47 = vpop.f32.mrf.mxu1 }
  0xd7   : > { %v673_v59 = vadd.f32 %v1101_v58, %v672_v47 }
  0xd8   : > { %v1215_v50 = vpop.f32.mrf.mxu1 }
 0x151   : > { %v742_v60 = vpop.f32.mrf.mxu1 }
 0x152   : > { %v743_v61 = vadd.f32 %v742_v60, %v673_v59 }
 0x153   : > { %v1250_v62 = vpop.f32.mrf.mxu1 }
 0x154   : > { %747 = vrot.lane.b32.xlu1 %v743_v61, %s1318_s16 }
 0x155   : > { %v570_v63 = vpop.f32.mrf.mxu0 }
 0x157   : > { %v1204_v0 = vpop.f32.mrf.mxu0 }
 0x1c6   : > { %v748_v1 = vpop.permute.xlu1 %747 }
 0x1c7   : > { %v750_v2 = vsel %vm602_vm1, %v570_v63, %v748_v1 }
 0x1c8   : > { %1268 = vmatmul.mubr.msk.f32.vlgmr.msra.gmra.mxu0 %vm766_vm4, %v750_v2 }
 0x1c9   : > { %1289 = vmatprep.mubr.msk.f32.mxu0 %vm1316_vm0, %v1315_v3  ;;  %1282 = vmatpush3.msra.mxu0 %v929_v7 }
 0x1ca   : > { %1283 = vmatprep.subr.mxu0 %v1315_v3 }
 0x1cb   : > { %1284 = vmatpush3.msra.mxu0 %v928_v13 }
 0x1cc   : > { %1285 = vmatprep.subr.mxu0 %v1315_v3 }
 0x1cd   : > { %1286 = vmatpush3.msra.mxu0 %v927_v14 }
 0x1ce   : > { %1287 = vmatprep.subr.mxu0 %v1315_v3 }
 0x1cf   : > { %1288 = vmatpush3.msra.mxu0 %v926_v15 }
 0x288   : > { %v836_v9 = vpop.f32.mrf.mxu0 }
 0x289   : > { %v837_v10 = vadd.f32 %v1104_v8, %v836_v9 }
 0x28a   : > { %v1269_v11 = vpop.f32.mrf.mxu0 }
 0x28b   : > { %v840_v12 = vmax.f32 %v837_v10, 0.0 }
 0x28d   : > { %1279 = vmatmul.mubr.msk.f32.vlgmr.msra.gmra.mxu1 %vm602_vm1, %v840_v12 }
 0x34d   : > { %v921_v17 = vpop.f32.mrf.mxu1 }
 0x34e   : > { %v922_v18 = vadd.f32 %v1106_v16, %v921_v17 }
 0x34f   : > { %v1280_v19 = vpop.f32.mrf.mxu1 }
 0x350   : > { %v925_v20 = vmax.f32 %v922_v18, 0.0 }
 0x352   : > { %1290 = vmatmul.mubr.msk.f32.vlgmr.msra.gmra.mxu0 %vm602_vm1, %v925_v20 }
 0x412   : > { %v1006_v3 = vpop.f32.mrf.mxu0 }
 0x413   : > { %v1007_v22 = vadd.f32 %v1108_v21, %v1006_v3 }
 0x414   : > { %v1291_v23 = vpop.f32.mrf.mxu0 }
 0x415   : > { %1011 = vst.msk [vmem:[%s471_s22] sm:$0xff] %vm1010_vm5, %v1007_v22 }
 0x416 PF: > { %s25_s27 = sadd.s32 1, %s1312_s27  }
 0x417   : > { %p22_p4 = scmp.ge.s32.totalorder %s25_s27, 4  }
 0x419   :  { %24 = sbr.rel (!%p22_p4) target bundleno = 3 (0x3), region = 108 }

</bundles_post_ra>
